<compile_context>
chip_gen: v7x
topology: tpu7x:2x2x1
jax: 0.10.0
libtpu: 0.0.40
codegen_flags: <defaults>
</compile_context>

<pallas_src>
import jax
import jax.numpy as jnp
from jax import lax
from jax.experimental import pallas as pl
from jax.experimental.pallas import tpu as pltpu

_MASK = -1e30   # "minus infinity" stand-in for masked logits (keeps f32 finite)


def _round_up(x: int, n: int) -> int:
    return (x + n - 1) // n * n


# ----------------------------------------------------------------------------
# Prologue: F.normalize(features) -> bf16, done once (rsqrt on the EUP slot).
# ----------------------------------------------------------------------------
def _normalize_kernel(x_ref, o_ref):
    x = x_ref[...].astype(jnp.float32)
    ss = jnp.sum(x * x, axis=1, keepdims=True)
    inv = lax.rsqrt(jnp.maximum(ss, 1e-24))        # == 1 / max(||x||_2, 1e-12)
    o_ref[...] = (x * inv).astype(jnp.bfloat16)


# ----------------------------------------------------------------------------
# Main kernel: flash-style row x key tiling with online per-row log-sum-exp.
# ----------------------------------------------------------------------------
def _make_circle_loss_kernel(m_margin, gamma, tm, tk, m_valid, m_pad):
    m_margin = float(m_margin)
    gamma = float(gamma)
    c_ap = 1.0 + m_margin              # relu threshold for alpha_p
    c_dp = gamma * (1.0 - m_margin)    # gamma * delta_p
    c_dn = gamma * m_margin            # gamma * delta_n
    has_pad = m_pad > m_valid          # compile-time specialization

    def kernel(fq_ref, fk_ref, pr_ref, pc_ref, o_ref,
               mp_ref, lp_ref, mn_ref, ln_ref):
        ki = pl.program_id(1)
        q0 = pl.program_id(0) * tm
        k0 = ki * tk

        # ---- reset per-row accumulators at the start of each row tile ------
        @pl.when(ki == 0)
        def _():
            mp_ref[...] = jnp.full((tm, 1), _MASK, jnp.float32)
            mn_ref[...] = jnp.full((tm, 1), _MASK, jnp.float32)
            lp_ref[...] = jnp.zeros((tm, 1), jnp.float32)
            ln_ref[...] = jnp.zeros((tm, 1), jnp.float32)

        # ---- cosine similarities on the MXU: bf16 in, f32 accumulate,
        #      contraction on the last dim of both operands (no transpose) ----
        s = lax.dot_general(
            fq_ref[...], fk_ref[...],
            dimension_numbers=(((1,), (1,)), ((), ())),
            preferred_element_type=jnp.float32)           # (tm, tk) f32

        # ---- pairwise label masks (booleans, tile-local iotas only) --------
        same = pr_ref[...] == pc_ref[...]                 # (tm,1)==(1,tk)
        row_g = q0 + lax.broadcasted_iota(jnp.int32, (tm, tk), 0)
        col_g = k0 + lax.broadcasted_iota(jnp.int32, (tm, tk), 1)
        pos = jnp.logical_and(same, row_g != col_g)       # positives, no diag
        neg = jnp.logical_not(same)
        if has_pad:                                       # drop padded columns
            col_ok = col_g < m_valid
            pos = jnp.logical_and(pos, col_ok)
            neg = jnp.logical_and(neg, col_ok)

        # ---- circle-loss logits, gamma folded into constants ---------------
        # logit_p = -g*relu(1+m-s)*(s-(1-m)) = relu(c_ap - s) * (c_dp - g*s)
        # logit_n =  g*relu(s+m)*(s-m)       = relu(s + m)    * (g*s  - c_dn)
        logit_p = jnp.maximum(c_ap - s, 0.0) * (c_dp - gamma * s)
        logit_n = jnp.maximum(s + m_margin, 0.0) * (gamma * s - c_dn)

        # ---- online LSE: new running per-row maxima -------------------------
        m_p = jnp.maximum(
            mp_ref[...],
            jnp.max(jnp.where(pos, logit_p, _MASK), axis=1, keepdims=True))
        m_n = jnp.maximum(
            mn_ref[...],
            jnp.max(jnp.where(neg, logit_n, _MASK), axis=1, keepdims=True))

        # ---- single exp pass over the disjoint pos/neg sets (EUP halved) ----
        shifted = jnp.where(pos, logit_p - m_p,
                            jnp.where(neg, logit_n - m_n, _MASK))
        e = jnp.exp(shifted)                              # exp(_MASK) -> 0
        sp_t = jnp.sum(jnp.where(pos, e, 0.0), axis=1, keepdims=True)
        sn_t = jnp.sum(jnp.where(neg, e, 0.0), axis=1, keepdims=True)

        lp_ref[...] = lp_ref[...] * jnp.exp(mp_ref[...] - m_p) + sp_t
        ln_ref[...] = ln_ref[...] * jnp.exp(mn_ref[...] - m_n) + sn_t
        mp_ref[...] = m_p
        mn_ref[...] = m_n

        # ---- finalize on the last key tile: softplus + row-tile sum ---------
        @pl.when(ki == pl.num_programs(1) - 1)
        def _():
            z = (mp_ref[...] + mn_ref[...]
                 + jnp.log(lp_ref[...]) + jnp.log(ln_ref[...]))
            spl = jnp.maximum(z, 0.0) + jnp.log1p(jnp.exp(-jnp.abs(z)))
            if has_pad:                                   # drop padded rows
                row_ok = (q0 + lax.broadcasted_iota(jnp.int32, (tm, 1), 0)
                          ) < m_valid
                spl = jnp.where(row_ok, spl, 0.0)
            # lane-dense scalar block; wrapper reads [:, 0, 0] and sums.
            o_ref[...] = jnp.full((1, 8, 128), jnp.sum(spl), jnp.float32)

    return kernel


def circle_loss_2(features: jnp.ndarray, pids: jnp.ndarray,
                  m: float = 0.25, gamma: float = 64.0) -> jnp.ndarray:
    """Pallas implementation of CircleLoss_2.forward(features, pids, dist='cos')."""
    if features.ndim != 2:
        raise ValueError("features must be (M, D)")
    if pids.shape[0] != features.shape[0]:
        raise ValueError("Error in the dim of the pids")
    M, D = features.shape

    # --- per-generation sizing (v7x: 64 MiB phys -> cap ~48; v5e/v6e -> ~96) --
    try:
        vmem_cap = int(pltpu.get_tpu_info().vmem_capacity_bytes)
    except Exception:
        vmem_cap = 64 * 2 ** 20                 # v7x-safe fallback
    vmem_limit = max(32 * 2 ** 20, min(vmem_cap * 3 // 4, 100 * 2 ** 20))

    m_pad = _round_up(M, 128)
    tk_candidates = (1024, 512, 256, 128) if vmem_cap >= 96 * 2 ** 20 else (512, 256, 128)
    TK = next(t for t in tk_candidates if m_pad % t == 0)
    TM = min(256, TK)                            # TM | TK | m_pad by construction
    n_qt, n_kt = m_pad // TM, m_pad // TK

    # --- pad rows only; keep native feature dtype (kernel upcasts) -----------
    feats_p = features if m_pad == M else jnp.pad(features, ((0, m_pad - M), (0, 0)))
    pids_p = pids.astype(jnp.int32)
    if m_pad != M:
        pids_p = jnp.pad(pids_p, (0, m_pad - M), constant_values=-1)

    # --- prologue: normalize + bf16 once, streamed by the key loop below -----
    fnorm = pl.pallas_call(
        _normalize_kernel,
        out_shape=jax.ShapeDtypeStruct((m_pad, D), jnp.bfloat16),
        grid_spec=pltpu.PrefetchScalarGridSpec(
            num_scalar_prefetch=0,
            grid=(n_qt,),
            in_specs=[pl.BlockSpec((TM, D), lambda i: (i, 0))],
            out_specs=pl.BlockSpec((TM, D), lambda i: (i, 0))),
        compiler_params=pltpu.CompilerParams(
            dimension_semantics=("parallel",),
            vmem_limit_bytes=vmem_limit),
    )(feats_p)

    # pid layouts: (TM,1)/(1,TK) per-tile blocks are tiny (<=128 KiB padded),
    # so both forms are passed to avoid an in-kernel sublane<->lane relayout.
    pid_row = pids_p.reshape(m_pad, 1)
    pid_col = pids_p.reshape(1, m_pad)

    kernel = _make_circle_loss_kernel(m, gamma, TM, TK, M, m_pad)
    cost = pl.CostEstimate(
        flops=int(2 * m_pad * m_pad * D + 12 * m_pad * m_pad),
        transcendentals=int(m_pad * m_pad + 6 * m_pad),
        bytes_accessed=int(n_qt * m_pad * D * 2 + m_pad * D * 2
                           + m_pad * 8 + n_qt * 8 * 128 * 4))

    partials = pl.pallas_call(
        kernel,
        out_shape=jax.ShapeDtypeStruct((n_qt, 8, 128), jnp.float32),
        grid_spec=pltpu.PrefetchScalarGridSpec(
            num_scalar_prefetch=0,
            grid=(n_qt, n_kt),
            in_specs=[
                pl.BlockSpec((TM, D), lambda qi, ki: (qi, 0)),   # query rows (bf16)
                pl.BlockSpec((TK, D), lambda qi, ki: (ki, 0)),   # key rows   (bf16)
                pl.BlockSpec((TM, 1), lambda qi, ki: (qi, 0)),   # row pids
                pl.BlockSpec((1, TK), lambda qi, ki: (0, ki)),   # col pids (lane-dense)
            ],
            out_specs=pl.BlockSpec((1, 8, 128), lambda qi, ki: (qi, 0, 0)),
            scratch_shapes=[pltpu.VMEM((TM, 1), jnp.float32) for _ in range(4)]),
        compiler_params=pltpu.CompilerParams(
            dimension_semantics=("parallel", "arbitrary"),
            vmem_limit_bytes=vmem_limit),
        cost_estimate=cost,
    )(fnorm, fnorm, pid_row, pid_col)

    # Tiny O(n_row_tiles) reduction + mean outside the kernel (keeps the row
    # axis truly "parallel" for v7x megacore sharding).
    return jnp.sum(partials[:, 0, 0]) / M


# ----------------------------------------------------------------------------
# Pure-JAX references for the self-check.
# ----------------------------------------------------------------------------
def _stable_softplus(z):
    return jnp.maximum(z, 0.0) + jnp.log1p(jnp.exp(-jnp.abs(z)))


def _masked_row_lse(x, mask):
    x = jnp.where(mask, x, -jnp.inf)
    mx = jnp.max(x, axis=1, keepdims=True)
    return (mx + jnp.log(jnp.sum(jnp.exp(x - mx), axis=1, keepdims=True)))[:, 0]


def _reference_circle_loss(features, pids, m, gamma, matmul_dtype=jnp.float32):
    """Numerically-stable formulation of the PyTorch cos branch (same math)."""
    M = features.shape[0]
    same = pids[:, None] == pids[None, :]
    eye = jnp.eye(M, dtype=bool)
    pos = same & ~eye
    neg = ~same
    norm = jnp.maximum(jnp.linalg.norm(features, axis=1, keepdims=True), 1e-12)
    f = (features / norm).astype(matmul_dtype)
    s = jnp.dot(f, f.T, preferred_element_type=jnp.float32).astype(jnp.float32)
    logit_p = -gamma * jnp.maximum(1.0 + m - s, 0.0) * (s - (1.0 - m))
    logit_n = gamma * jnp.maximum(s + m, 0.0) * (s - m)
    z = _masked_row_lse(logit_p, pos) + _masked_row_lse(logit_n, neg)
    return jnp.mean(_stable_softplus(z))


if __name__ == "__main__":
    key = jax.random.PRNGKey(0)
    M, D = 8, 32                      # small: 8 samples, 32-dim features
    m_margin, gamma = 0.25, 64.0      # module hyperparameters (deterministic)

    features = jax.random.normal(key, (M, D), dtype=jnp.float32)
    # each identity appears twice so every row has both positives and negatives
    pids = jnp.array([0, 0, 1, 1, 2, 2, 3, 3], dtype=jnp.int32)

    loss = jax.block_until_ready(
        circle_loss_2(features, pids, m=m_margin, gamma=gamma))

    # (1) Tight check against a reference using the same bf16-rounded features.
    ref_bf16 = _reference_circle_loss(features, pids, m_margin, gamma,
                                      matmul_dtype=jnp.bfloat16)
    assert jnp.allclose(loss, ref_bf16, rtol=5e-3, atol=5e-3), (loss, ref_bf16)

    # (2) Looser check against the full-f32 formulation (bf16 MXU inputs
    #     perturb cosines by ~1e-3; gamma=64 amplifies -> sub-percent effect).
    ref_f32 = _reference_circle_loss(features, pids, m_margin, gamma,
                                     matmul_dtype=jnp.float32)
    assert jnp.allclose(loss, ref_f32, rtol=5e-2, atol=5e-2), (loss, ref_f32)

    print("KERNEL_OK")
</pallas_src>

<mosaic_0001>
module attributes {stable_mosaic.version = 11 : i64} {
  func.func @_normalize_kernel(%arg0: i32, %arg1: memref<128x32xf32, #tpu.memory_space<vmem>>, %arg2: memref<128x32xbf16, #tpu.memory_space<vmem>>) attributes {dimension_semantics = [#tpu.dimension_semantics<parallel>], iteration_bounds = array<i64: 1>, scalar_prefetch = 0 : i64, scratch_operands = 0 : i64, tpu.core_type = #tpu.core_type<tc>, window_params = [{transform_indices = @transform_0, window_bounds = array<i64: 128, 32>}, {transform_indices = @transform_1, window_bounds = array<i64: 128, 32>}]} {
    %c0 = arith.constant 0 : index
    %c0_0 = arith.constant 0 : index
    %0 = vector.load %arg1[%c0, %c0_0] : memref<128x32xf32, #tpu.memory_space<vmem>>, vector<128x32xf32>
    %1 = arith.mulf %0, %0 : vector<128x32xf32>
    %cst = arith.constant dense<0.000000e+00> : vector<128xf32>
    %2 = vector.multi_reduction <add>, %1, %cst [1] : vector<128x32xf32> to vector<128xf32>
    %3 = vector.shape_cast %2 : vector<128xf32> to vector<128x1xf32>
    %cst_1 = arith.constant 1.000000e-24 : f32
    %4 = vector.broadcast %cst_1 : f32 to vector<128x1xf32>
    %5 = arith.maximumf %3, %4 : vector<128x1xf32>
    %6 = math.rsqrt %5 : vector<128x1xf32>
    %7 = vector.broadcast %6 : vector<128x1xf32> to vector<128x32xf32>
    %8 = arith.mulf %0, %7 : vector<128x32xf32>
    %9 = arith.truncf %8 : vector<128x32xf32> to vector<128x32xbf16>
    %c0_2 = arith.constant 0 : index
    %c0_3 = arith.constant 0 : index
    %10 = vector.load %arg2[%c0_2, %c0_3] : memref<128x32xbf16, #tpu.memory_space<vmem>>, vector<128x32xbf16>
    tpu.vector_store %arg2[%c0_2, %c0_3], %9 {strides = array<i32>} : memref<128x32xbf16, #tpu.memory_space<vmem>>, vector<128x32xbf16>,
    return
  }
  func.func @transform_0(%arg0: i32) -> (i32, i32) {
    %c0_i32 = arith.constant 0 : i32
    %c0_i32_0 = arith.constant 0 : i32
    return %arg0, %c0_i32 : i32, i32
  }
  func.func @transform_1(%arg0: i32) -> (i32, i32) {
    %c0_i32 = arith.constant 0 : i32
    %c0_i32_0 = arith.constant 0 : i32
    return %arg0, %c0_i32 : i32, i32
  }
}

</mosaic_0001>

<bundles_post_ra>
// kernel: tpu_custom_call.1
= control target key start
LH: loop header
LB: loop body
LE: loop exit
PB: predicated region body
PF: predicated region fallthrough
CT: control target
= control target key end

     0   :  { %vm40_vm0 = vcmask 261120   ;;  %vm201_vm1 = vcmask 257024   ;;  %s504_s0 = inlined_call_operand.vmem [shape: f32[128,32], index: 0, kind: input, shape index: {}]   ;;  %s505_s1 = inlined_call_operand.vmem [shape: bf16[128,32], index: 1, kind: output, shape index: {}]  }
   0x1   :  { %v299_v0 = vld [vmem:[%s504_s0 + $0x10] sm:$0xff]  ;;  %v304_v1 = vld [vmem:[%s504_s0] sm:$0xff]  ;;  %v309_v2 = vld [vmem:[%s504_s0 + $0x18] sm:$0xff] }
   0x2   :  { %v26_v3 = vmul.f32 %v299_v0, %v299_v0  ;;  %v24_v4 = vmul.f32 %v304_v1, %v304_v1  ;;  %v27_v5 = vmul.f32 %v309_v2, %v309_v2  ;;  %v320_v6 = vld [vmem:[%s504_s0 + $0x8] sm:$0xff]  ;;  %v332_v9 = vld [vmem:[%s504_s0 + $0x20] sm:$0xff]  ;;  %v345_v16 = vld [vmem:[%s504_s0 + $0x38] sm:$0xff] }
   0x3   :  { %v25_v7 = vmul.f32 %v320_v6, %v320_v6  ;;  %v327_v8 = vld [vmem:[%s504_s0 + $0x28] sm:$0xff]  ;;  %v28_v15 = vmul.f32 %v332_v9, %v332_v9  ;;  %v350_v17 = vld [vmem:[%s504_s0 + $0x30] sm:$0xff]  ;;  %v31_v20 = vmul.f32 %v345_v16, %v345_v16  ;;  %v366_v23 = vld [vmem:[%s504_s0 + $0x40] sm:$0xff] }
   0x4   :  { %v47_v10 = vsel %vm40_vm0, %v26_v3, 0.0  ;;  %v41_v11 = vsel %vm40_vm0, %v24_v4, 0.0  ;;  %v50_v12 = vsel %vm40_vm0, %v27_v5, 0.0  ;;  %v29_v14 = vmul.f32 %v327_v8, %v327_v8  ;;  %v361_v22 = vld [vmem:[%s504_s0 + $0x48] sm:$0xff]  ;;  %v377_v28 = vld [vmem:[%s504_s0 + $0x58] sm:$0xff]  ;;  %v382_v29 = vld [vmem:[%s504_s0 + $0x50] sm:$0xff] }
   0x5   :  { %48 = vadd.xlane.f32.xlu1 %v47_v10  ;;  %42 = vadd.xlane.f32.xlu0 %v41_v11  ;;  %v44_v13 = vsel %vm40_vm0, %v25_v7, 0.0  ;;  %v53_v19 = vsel %vm40_vm0, %v28_v15, 0.0  ;;  %v30_v21 = vmul.f32 %v350_v17, %v350_v17  ;;  %v62_v24 = vsel %vm40_vm0, %v31_v20, 0.0  ;;  %v393_v34 = vld [vmem:[%s504_s0 + $0x68] sm:$0xff]  ;;  %v398_v35 = vld [vmem:[%s504_s0 + $0x60] sm:$0xff]  ;;  %v409_v40 = vld [vmem:[%s504_s0 + $0x78] sm:$0xff] }
   0x6   :  { %v56_v18 = vsel %vm40_vm0, %v29_v14, 0.0  ;;  %v33_v26 = vmul.f32 %v361_v22, %v361_v22  ;;  %v32_v27 = vmul.f32 %v366_v23, %v366_v23  ;;  %v35_v32 = vmul.f32 %v377_v28, %v377_v28  ;;  %v414_v41 = vld [vmem:[%s504_s0 + $0x70] sm:$0xff] }
   0x7   :  { %v59_v25 = vsel %vm40_vm0, %v30_v21, 0.0  ;;  %v34_v33 = vmul.f32 %v382_v29, %v382_v29  ;;  %v37_v38 = vmul.f32 %v393_v34, %v393_v34  ;;  %v36_v39 = vmul.f32 %v398_v35, %v398_v35 }
   0x8   :  { %v68_v30 = vsel %vm40_vm0, %v33_v26, 0.0  ;;  %v65_v31 = vsel %vm40_vm0, %v32_v27, 0.0  ;;  %v74_v36 = vsel %vm40_vm0, %v35_v32, 0.0  ;;  %v39_v44 = vmul.f32 %v409_v40, %v409_v40 }
   0x9   :  { %51 = vadd.xlane.f32.xlu1 %v50_v12  ;;  %45 = vadd.xlane.f32.xlu0 %v44_v13  ;;  %v71_v37 = vsel %vm40_vm0, %v34_v33, 0.0  ;;  %v80_v42 = vsel %vm40_vm0, %v37_v38, 0.0  ;;  %v77_v43 = vsel %vm40_vm0, %v36_v39, 0.0  ;;  %v38_v45 = vmul.f32 %v414_v41, %v414_v41 }
   0xa   :  { %v86_v46 = vsel %vm40_vm0, %v39_v44, 0.0 }
   0xb   :  { %v83_v47 = vsel %vm40_vm0, %v38_v45, 0.0 }
   0xd   :  { %57 = vadd.xlane.f32.xlu1 %v56_v18  ;;  %54 = vadd.xlane.f32.xlu0 %v53_v19 }
  0x11   :  { %63 = vadd.xlane.f32.xlu1 %v62_v24  ;;  %60 = vadd.xlane.f32.xlu0 %v59_v25 }
  0x15   :  { %69 = vadd.xlane.f32.xlu1 %v68_v30  ;;  %66 = vadd.xlane.f32.xlu0 %v65_v31 }
  0x19   :  { %75 = vadd.xlane.f32.xlu1 %v74_v36  ;;  %72 = vadd.xlane.f32.xlu0 %v71_v37 }
  0x1d   :  { %81 = vadd.xlane.f32.xlu1 %v80_v42  ;;  %78 = vadd.xlane.f32.xlu0 %v77_v43 }
  0x21   :  { %87 = vadd.xlane.f32.xlu1 %v86_v46  ;;  %84 = vadd.xlane.f32.xlu0 %v83_v47 }
  0x92   :  { %v49_v48 = vpop.xlane.xlu1 %48  ;;  %v43_v49 = vpop.xlane.xlu0 %42 }
  0x93   :  { %v91_v50 = vmax.f32 %v49_v48, 1e-24  ;;  %v89_v51 = vmax.f32 %v43_v49, 1e-24 }
  0x95   :  { %254 = vrsqrt.f32 %v91_v50 }
  0x96   :  { %256 = vrsqrt.f32 %v89_v51  ;;  %v52_v52 = vpop.xlane.xlu1 %51  ;;  %v46_v53 = vpop.xlane.xlu0 %45 }
  0x97   :  { %v92_v54 = vmax.f32 %v52_v52, 1e-24  ;;  %v90_v55 = vmax.f32 %v46_v53, 1e-24 }
  0x99   :  { %258 = vrsqrt.f32 %v92_v54 }
  0x9a   :  { %260 = vrsqrt.f32 %v90_v55  ;;  %v58_v56 = vpop.xlane.xlu1 %57  ;;  %v55_v57 = vpop.xlane.xlu0 %54 }
  0x9b   :  { %v94_v58 = vmax.f32 %v58_v56, 1e-24  ;;  %v93_v59 = vmax.f32 %v55_v57, 1e-24 }
  0x9d   :  { %262 = vrsqrt.f32 %v94_v58 }
  0x9e   :  { %264 = vrsqrt.f32 %v93_v59  ;;  %v64_v60 = vpop.xlane.xlu1 %63  ;;  %v61_v61 = vpop.xlane.xlu0 %60 }
  0x9f   :  { %v255_v62 = vpop.eup %254  ;;  %v96_v63 = vmax.f32 %v64_v60, 1e-24  ;;  %v95_v3 = vmax.f32 %v61_v61, 1e-24 }
  0xa0   :  { %v257_v4 = vpop.eup %256  ;;  %v123_v5 = vmul.f32 %v255_v62, %v299_v0 }
  0xa1   :  { %v121_v7 = vmul.f32 %v257_v4, %v304_v1  ;;  %266 = vrsqrt.f32 %v96_v63 }
  0xa2   :  { %v240_v10 = vpack.c.bf16 %v123_v5, %v123_v5  ;;  %268 = vrsqrt.f32 %v95_v3  ;;  %v70_v11 = vpop.xlane.xlu1 %69  ;;  %v67_v12 = vpop.xlane.xlu0 %66 }
  0xa3   :  { %v259_v13 = vpop.eup %258  ;;  %v238_v14 = vpack.c.bf16 %v121_v7, %v121_v7  ;;  %v98_v15 = vmax.f32 %v70_v11, 1e-24  ;;  %v97_v18 = vmax.f32 %v67_v12, 1e-24 }
  0xa4   :  { %v261_v19 = vpop.eup %260  ;;  %204 = vst.msk [vmem:[%s505_s1 + $0x8] sm:$0xf] %vm201_vm1, %v240_v10  ;;  %v124_v0 = vmul.f32 %v259_v13, %v309_v2 }
  0xa5   :  { %202 = vst.msk [vmem:[%s505_s1] sm:$0xf] %vm201_vm1, %v238_v14  ;;  %v122_v1 = vmul.f32 %v261_v19, %v320_v6  ;;  %270 = vrsqrt.f32 %v98_v15 }
  0xa6   :  { %v241_v20 = vpack.c.bf16 %v124_v0, %v124_v0  ;;  %272 = vrsqrt.f32 %v97_v18  ;;  %v76_v21 = vpop.xlane.xlu1 %75  ;;  %v73_v24 = vpop.xlane.xlu0 %72 }
  0xa7   :  { %v263_v25 = vpop.eup %262  ;;  %v239_v26 = vpack.c.bf16 %v122_v1, %v122_v1  ;;  %v100_v27 = vmax.f32 %v76_v21, 1e-24  ;;  %v99_v30 = vmax.f32 %v73_v24, 1e-24 }
  0xa8   :  { %v265_v31 = vpop.eup %264  ;;  %205 = vst.msk [vmem:[%s505_s1 + $0xc] sm:$0xf] %vm201_vm1, %v241_v20  ;;  %v126_v2 = vmul.f32 %v263_v25, %v327_v8 }
  0xa9   :  { %203 = vst.msk [vmem:[%s505_s1 + $0x4] sm:$0xf] %vm201_vm1, %v239_v26  ;;  %v125_v6 = vmul.f32 %v265_v31, %v332_v9  ;;  %274 = vrsqrt.f32 %v100_v27 }
  0xaa   :  { %v243_v32 = vpack.c.bf16 %v126_v2, %v126_v2  ;;  %276 = vrsqrt.f32 %v99_v30  ;;  %v82_v33 = vpop.xlane.xlu1 %81  ;;  %v79_v36 = vpop.xlane.xlu0 %78 }
  0xab   :  { %v267_v37 = vpop.eup %266  ;;  %v242_v38 = vpack.c.bf16 %v125_v6, %v125_v6  ;;  %v102_v39 = vmax.f32 %v82_v33, 1e-24  ;;  %v101_v42 = vmax.f32 %v79_v36, 1e-24 }
  0xac   :  { %v269_v43 = vpop.eup %268  ;;  %207 = vst.msk [vmem:[%s505_s1 + $0x14] sm:$0xf] %vm201_vm1, %v243_v32  ;;  %v128_v8 = vmul.f32 %v267_v37, %v345_v16 }
  0xad   :  { %206 = vst.msk [vmem:[%s505_s1 + $0x10] sm:$0xf] %vm201_vm1, %v242_v38  ;;  %v127_v9 = vmul.f32 %v269_v43, %v350_v17  ;;  %278 = vrsqrt.f32 %v102_v39 }
  0xae   :  { %v245_v44 = vpack.c.bf16 %v128_v8, %v128_v8  ;;  %280 = vrsqrt.f32 %v101_v42  ;;  %v88_v45 = vpop.xlane.xlu1 %87  ;;  %v85_v46 = vpop.xlane.xlu0 %84 }
  0xaf   :  { %v271_v47 = vpop.eup %270  ;;  %v244_v48 = vpack.c.bf16 %v127_v9, %v127_v9  ;;  %v104_v49 = vmax.f32 %v88_v45, 1e-24  ;;  %v103_v50 = vmax.f32 %v85_v46, 1e-24 }
  0xb0   :  { %v273_v51 = vpop.eup %272  ;;  %209 = vst.msk [vmem:[%s505_s1 + $0x1c] sm:$0xf] %vm201_vm1, %v245_v44  ;;  %v130_v16 = vmul.f32 %v271_v47, %v361_v22 }
  0xb1   :  { %208 = vst.msk [vmem:[%s505_s1 + $0x18] sm:$0xf] %vm201_vm1, %v244_v48  ;;  %v129_v17 = vmul.f32 %v273_v51, %v366_v23  ;;  %282 = vrsqrt.f32 %v104_v49 }
  0xb2   :  { %v247_v52 = vpack.c.bf16 %v130_v16, %v130_v16  ;;  %284 = vrsqrt.f32 %v103_v50 }
  0xb3   :  { %v275_v53 = vpop.eup %274  ;;  %v246_v54 = vpack.c.bf16 %v129_v17, %v129_v17 }
  0xb4   :  { %v277_v55 = vpop.eup %276  ;;  %211 = vst.msk [vmem:[%s505_s1 + $0x24] sm:$0xf] %vm201_vm1, %v247_v52  ;;  %v132_v22 = vmul.f32 %v275_v53, %v377_v28 }
  0xb5   :  { %210 = vst.msk [vmem:[%s505_s1 + $0x20] sm:$0xf] %vm201_vm1, %v246_v54  ;;  %v131_v23 = vmul.f32 %v277_v55, %v382_v29 }
  0xb6   :  { %v249_v56 = vpack.c.bf16 %v132_v22, %v132_v22 }
  0xb7   :  { %v279_v57 = vpop.eup %278  ;;  %v248_v58 = vpack.c.bf16 %v131_v23, %v131_v23 }
  0xb8   :  { %v281_v59 = vpop.eup %280  ;;  %213 = vst.msk [vmem:[%s505_s1 + $0x2c] sm:$0xf] %vm201_vm1, %v249_v56  ;;  %v134_v60 = vmul.f32 %v279_v57, %v393_v34 }
  0xb9   :  { %212 = vst.msk [vmem:[%s505_s1 + $0x28] sm:$0xf] %vm201_vm1, %v248_v58  ;;  %v133_v28 = vmul.f32 %v281_v59, %v398_v35 }
  0xba   :  { %v251_v61 = vpack.c.bf16 %v134_v60, %v134_v60 }
  0xbb   :  { %v283_v29 = vpop.eup %282  ;;  %v250_v62 = vpack.c.bf16 %v133_v28, %v133_v28 }
  0xbc   :  { %v285_v63 = vpop.eup %284  ;;  %215 = vst.msk [vmem:[%s505_s1 + $0x34] sm:$0xf] %vm201_vm1, %v251_v61  ;;  %v136_v3 = vmul.f32 %v283_v29, %v409_v40 }
  0xbd   :  { %214 = vst.msk [vmem:[%s505_s1 + $0x30] sm:$0xf] %vm201_vm1, %v250_v62  ;;  %v135_v34 = vmul.f32 %v285_v63, %v414_v41 }
  0xbe   :  { %v253_v4 = vpack.c.bf16 %v136_v3, %v136_v3 }
  0xbf   :  { %v252_v35 = vpack.c.bf16 %v135_v34, %v135_v34 }
  0xc0   :  { %217 = vst.msk [vmem:[%s505_s1 + $0x3c] sm:$0xf] %vm201_vm1, %v253_v4 }
  0xc1   :  { %216 = vst.msk [vmem:[%s505_s1 + $0x38] sm:$0xf] %vm201_vm1, %v252_v35 }

</bundles_post_ra>
